<compile_context>
chip_gen: v7x
topology: tpu7x:2x2x1
jax: 0.10.0
libtpu: 0.0.40
codegen_flags: <defaults>
</compile_context>

<pallas_src>
import functools

import jax
import jax.numpy as jnp
from jax.experimental import pallas as pl
from jax.experimental.pallas import tpu as pltpu


# ----------------------------------------------------------------------------
# Fast path: whole (Bt, C, HW) block resident; fused stats + SE + gate.
# ----------------------------------------------------------------------------
def _csa_fused_kernel(x_ref, w1_ref, b1_ref, w2_ref, b2_ref, o_ref, *, inv_hw):
    """x:(Bt,C,HW)  w1:(C,Cr)  b1:(1,Cr)  w2:(Cr,C)  b2:(1,C)  o:(Bt,C,HW)."""
    xb = x_ref[...].astype(jnp.float32)                         # (Bt, C, HW)

    # Single-pass statistics: sum and sum-of-squares (lane reductions).
    s = jnp.sum(xb, axis=2)                                     # (Bt, C)
    sq = jnp.sum(xb * xb, axis=2)                               # (Bt, C)
    mean = s * inv_hw
    var = jnp.maximum(sq * inv_hw - mean * mean, 0.0)           # clamp: no sqrt(neg)
    y = mean + jnp.sqrt(var)                                    # contrast + avg-pool

    # conv_du[0] (C->Cr) + ReLU, conv_du[2] (Cr->C) + sigmoid, f32 accumulation.
    z = jnp.dot(y, w1_ref[...], preferred_element_type=jnp.float32) + b1_ref[...]
    z = jnp.maximum(z, 0.0)                                     # (Bt, Cr)
    g = jnp.dot(z, w2_ref[...], preferred_element_type=jnp.float32) + b2_ref[...]
    g = jax.nn.sigmoid(g)                                       # (Bt, C)

    # Gate: broadcast per-(batch,channel) scale over the lane-dense spatial axis.
    o_ref[...] = (xb * g[:, :, None]).astype(o_ref.dtype)


# ----------------------------------------------------------------------------
# Two-pass fallback for large activations (block > VMEM budget).
# Pass 1: stream sum/sumsq over spatial tiles; compute the gate at the last tile.
# ----------------------------------------------------------------------------
def _csa_stats_kernel(x_ref, w1t_ref, b1_ref, w2_ref, b2_ref, g_ref,
                      s_acc, sq_acc, *, inv_hw):
    """x:(1,C,T)  w1t:(C,Cr)  b1:(1,Cr)  w2:(C,Cr)  b2:(C,1)  g:(1,C,1)."""
    t = pl.program_id(1)

    @pl.when(t == 0)
    def _():
        s_acc[...] = jnp.zeros_like(s_acc)
        sq_acc[...] = jnp.zeros_like(sq_acc)

    xc = x_ref[0].astype(jnp.float32)                           # (C, T)
    s_acc[...] += jnp.sum(xc, axis=1, keepdims=True)            # (C, 1)
    sq_acc[...] += jnp.sum(xc * xc, axis=1, keepdims=True)      # (C, 1)

    @pl.when(t == pl.num_programs(1) - 1)
    def _():
        mean = s_acc[...] * inv_hw                              # (C, 1)
        var = jnp.maximum(sq_acc[...] * inv_hw - mean * mean, 0.0)
        y = mean + jnp.sqrt(var)                                # (C, 1)
        # Tiny channel mix: broadcast-mul + sublane/lane reductions (no transposes).
        z = jnp.sum(w1t_ref[...] * y, axis=0, keepdims=True) + b1_ref[...]   # (1, Cr)
        z = jnp.maximum(z, 0.0)
        g = jnp.sum(w2_ref[...] * z, axis=1, keepdims=True) + b2_ref[...]    # (C, 1)
        g_ref[0] = jax.nn.sigmoid(g)


# Pass 2: re-stream x tiles and apply the gate.
def _csa_gate_kernel(x_ref, g_ref, o_ref):
    """x:(1,C,T)  g:(1,C,1)  o:(1,C,T)."""
    o_ref[0] = (x_ref[0].astype(jnp.float32) * g_ref[0]).astype(o_ref.dtype)


# ----------------------------------------------------------------------------
# Sizing helpers
# ----------------------------------------------------------------------------
def _largest_divisor_leq(n, cap):
    cap = max(1, min(int(cap), n))
    for d in range(cap, 0, -1):
        if n % d == 0:
            return d
    return 1


def _pick_spatial_tile(hw, c, itemsize, target_bytes):
    """Largest multiple-of-128 divisor of HW fitting target_bytes, else full HW."""
    cap = max(1, target_bytes // max(1, c * itemsize))
    for d in range(min(cap, hw), 0, -1):
        if hw % d == 0 and d % 128 == 0:
            return d
    return hw  # full-dim block is always layout-legal


# ----------------------------------------------------------------------------
# Wrappers
# ----------------------------------------------------------------------------
_TARGET_BLOCK_BYTES = 2 << 20  # ~2 MiB per grid-step block keeps all gens happy.


def _csa_fused(x_nchw, params, *, donate_x=False):
    B, C, H, W = x_nchw.shape
    Cr = params["w1"].shape[0]
    HW = H * W
    itemsize = jnp.dtype(x_nchw.dtype).itemsize
    per_batch_bytes = C * HW * itemsize

    # Pack as many batch items per grid step as the block budget allows.
    Bt = _largest_divisor_leq(B, max(1, _TARGET_BLOCK_BYTES // per_batch_bytes))
    block_bytes = Bt * per_batch_bytes
    block_f32_bytes = Bt * C * HW * 4

    x2 = x_nchw.reshape(B, C, HW)                                   # pure view
    w1 = jnp.transpose(params["w1"].reshape(Cr, C), (1, 0)).astype(jnp.float32)  # (C,Cr)
    b1 = params["b1"].reshape(1, Cr).astype(jnp.float32)
    w2 = jnp.transpose(params["w2"].reshape(C, Cr), (1, 0)).astype(jnp.float32)  # (Cr,C)
    b2 = params["b2"].reshape(1, C).astype(jnp.float32)
    param_bytes = 4 * (w1.size + b1.size + w2.size + b2.size)

    # 2x double-buffered in + 2x out + ~2 f32-block temporaries + params + slack.
    vmem_limit = int(min(4 * block_bytes + 2 * block_f32_bytes + 2 * param_bytes
                         + (2 << 20), 96 << 20))

    extra = {"input_output_aliases": {0: 0}} if donate_x else {}

    out = pl.pallas_call(
        functools.partial(_csa_fused_kernel, inv_hw=1.0 / float(HW)),
        out_shape=jax.ShapeDtypeStruct((B, C, HW), x_nchw.dtype),
        grid=(B // Bt,),
        in_specs=[
            pl.BlockSpec((Bt, C, HW), lambda b: (b, 0, 0)),
            pl.BlockSpec((C, Cr), lambda b: (0, 0)),
            pl.BlockSpec((1, Cr), lambda b: (0, 0)),
            pl.BlockSpec((Cr, C), lambda b: (0, 0)),
            pl.BlockSpec((1, C), lambda b: (0, 0)),
        ],
        out_specs=pl.BlockSpec((Bt, C, HW), lambda b: (b, 0, 0)),
        compiler_params=pltpu.CompilerParams(
            dimension_semantics=("parallel",),
            vmem_limit_bytes=vmem_limit),
        cost_estimate=pl.CostEstimate(
            flops=5 * B * C * HW,
            transcendentals=2 * B * C,
            bytes_accessed=2 * B * C * HW * itemsize),
        **extra,
    )(x2, w1, b1, w2, b2)
    return out.reshape(B, C, H, W)


def _csa_two_pass(x_nchw, params, *, spatial_tile=None):
    B, C, H, W = x_nchw.shape
    Cr = params["w1"].shape[0]
    HW = H * W
    itemsize = jnp.dtype(x_nchw.dtype).itemsize

    if spatial_tile is None:
        spatial_tile = _pick_spatial_tile(HW, C, itemsize, _TARGET_BLOCK_BYTES)
    assert HW % spatial_tile == 0
    nT = HW // spatial_tile
    tile_bytes = C * spatial_tile * itemsize
    vmem_limit = int(min(4 * tile_bytes + 2 * C * spatial_tile * 4 + (2 << 20),
                         96 << 20))

    x2 = x_nchw.reshape(B, C, HW)
    w1t = jnp.transpose(params["w1"].reshape(Cr, C), (1, 0)).astype(jnp.float32)  # (C,Cr)
    b1 = params["b1"].reshape(1, Cr).astype(jnp.float32)
    w2 = params["w2"].reshape(C, Cr).astype(jnp.float32)                          # (C,Cr)
    b2 = params["b2"].reshape(C, 1).astype(jnp.float32)

    # Pass 1: streaming stats -> per-(batch, channel) gate.
    gate = pl.pallas_call(
        functools.partial(_csa_stats_kernel, inv_hw=1.0 / float(HW)),
        out_shape=jax.ShapeDtypeStruct((B, C, 1), jnp.float32),
        grid=(B, nT),
        in_specs=[
            pl.BlockSpec((1, C, spatial_tile), lambda b, t: (b, 0, t)),
            pl.BlockSpec((C, Cr), lambda b, t: (0, 0)),
            pl.BlockSpec((1, Cr), lambda b, t: (0, 0)),
            pl.BlockSpec((C, Cr), lambda b, t: (0, 0)),
            pl.BlockSpec((C, 1), lambda b, t: (0, 0)),
        ],
        out_specs=pl.BlockSpec((1, C, 1), lambda b, t: (b, 0, 0)),
        scratch_shapes=[pltpu.VMEM((C, 1), jnp.float32),
                        pltpu.VMEM((C, 1), jnp.float32)],
        compiler_params=pltpu.CompilerParams(
            dimension_semantics=("parallel", "arbitrary"),
            vmem_limit_bytes=vmem_limit),
        cost_estimate=pl.CostEstimate(
            flops=3 * B * C * HW, transcendentals=2 * B * C,
            bytes_accessed=B * C * HW * itemsize),
    )(x2, w1t, b1, w2, b2)

    # Pass 2: re-stream x tiles and apply the gate.
    out = pl.pallas_call(
        _csa_gate_kernel,
        out_shape=jax.ShapeDtypeStruct((B, C, HW), x_nchw.dtype),
        grid=(B, nT),
        in_specs=[
            pl.BlockSpec((1, C, spatial_tile), lambda b, t: (b, 0, t)),
            pl.BlockSpec((1, C, 1), lambda b, t: (b, 0, 0)),
        ],
        out_specs=pl.BlockSpec((1, C, spatial_tile), lambda b, t: (b, 0, t)),
        compiler_params=pltpu.CompilerParams(
            dimension_semantics=("parallel", "parallel"),
            vmem_limit_bytes=vmem_limit),
        cost_estimate=pl.CostEstimate(
            flops=B * C * HW, transcendentals=0,
            bytes_accessed=2 * B * C * HW * itemsize),
    )(x2, gate)
    return out.reshape(B, C, H, W)


def csa_layer_forward(x_nchw, params, *, force_two_pass=False, spatial_tile=None,
                      donate_x=False):
    """x_nchw: (B, C, H, W).  params: PyTorch-layout conv_du weights."""
    B, C, H, W = x_nchw.shape
    per_batch_bytes = C * H * W * jnp.dtype(x_nchw.dtype).itemsize
    if force_two_pass or per_batch_bytes > _TARGET_BLOCK_BYTES:
        # Block too large to hold resident (v7x VMEM is only 64 MiB): spatially
        # tiled two-pass variant (1.5x HBM traffic, never spills).
        return _csa_two_pass(x_nchw, params, spatial_tile=spatial_tile)
    return _csa_fused(x_nchw, params, donate_x=donate_x)


# ----------------------------------------------------------------------------
# Parameters (PyTorch Conv2d layouts: weight (Cout, Cin, 1, 1), bias (Cout,))
# ----------------------------------------------------------------------------
def init_params(key, channel, reduction=4):
    cr = channel // reduction
    k1, k2, k3, k4 = jax.random.split(key, 4)
    rnd = lambda k, shape: jax.random.normal(k, shape, jnp.float32) * 0.1
    return {
        "w1": rnd(k1, (cr, channel, 1, 1)),   # conv_du[0].weight
        "b1": rnd(k2, (cr,)),                 # conv_du[0].bias
        "w2": rnd(k3, (channel, cr, 1, 1)),   # conv_du[2].weight
        "b2": rnd(k4, (channel,)),            # conv_du[2].bias
    }


# ----------------------------------------------------------------------------
# Pure-JAX reference (numerical sanity check)
# ----------------------------------------------------------------------------
def ref_forward(x, params):
    B, C, H, W = x.shape
    Cr = params["w1"].shape[0]
    mean = jnp.mean(x, axis=(2, 3), keepdims=True)
    var = jnp.mean((x - mean) ** 2, axis=(2, 3), keepdims=True)
    y = mean + jnp.sqrt(var)                                   # contrast + avg_pool
    w1 = params["w1"].reshape(Cr, C)
    w2 = params["w2"].reshape(C, Cr)
    z = jax.nn.relu(jnp.einsum("rc,bcij->brij", w1, y)
                    + params["b1"][None, :, None, None])
    g = jax.nn.sigmoid(jnp.einsum("cr,brij->bcij", w2, z)
                       + params["b2"][None, :, None, None])
    return x * g


# ----------------------------------------------------------------------------
if __name__ == "__main__":
    key = jax.random.PRNGKey(0)
    B, C, H, W = 2, 16, 16, 16          # channel=16, reduction=4 -> Cr=4
    kx, kp = jax.random.split(key)
    x = jax.random.normal(kx, (B, C, H, W), jnp.float32)
    params = init_params(kp, C, reduction=4)

    ref = jax.block_until_ready(ref_forward(x, params))

    # Fast fused path (batch-packed, single pallas_call).
    out = jax.block_until_ready(csa_layer_forward(x, params))
    assert out.shape == x.shape
    assert bool(jnp.all(jnp.isfinite(out)))
    max_diff = float(jnp.max(jnp.abs(out - ref)))
    assert max_diff < 1e-3, f"fused path mismatch vs reference: {max_diff}"

    # Also exercise the large-activation two-pass fallback (small tile forces
    # the streaming-accumulator path) and check it agrees with the reference.
    out2 = jax.block_until_ready(
        csa_layer_forward(x, params, force_two_pass=True, spatial_tile=128))
    max_diff2 = float(jnp.max(jnp.abs(out2 - ref)))
    assert max_diff2 < 1e-3, f"two-pass path mismatch vs reference: {max_diff2}"

    print("KERNEL_OK")
</pallas_src>

<mosaic_0001>
module attributes {stable_mosaic.version = 11 : i64} {
  func.func @_csa_fused_kernel(%arg0: i32, %arg1: memref<2x16x256xf32, #tpu.memory_space<vmem>>, %arg2: memref<16x4xf32, #tpu.memory_space<vmem>>, %arg3: memref<1x4xf32, #tpu.memory_space<vmem>>, %arg4: memref<4x16xf32, #tpu.memory_space<vmem>>, %arg5: memref<1x16xf32, #tpu.memory_space<vmem>>, %arg6: memref<2x16x256xf32, #tpu.memory_space<vmem>>) attributes {dimension_semantics = [#tpu.dimension_semantics<parallel>], iteration_bounds = array<i64: 1>, scalar_prefetch = 0 : i64, scratch_operands = 0 : i64, tpu.core_type = #tpu.core_type<tc>, window_params = [{transform_indices = @transform_0, window_bounds = array<i64: 2, 16, 256>}, {pipeline_mode = #tpu.pipeline_mode<synchronous>, transform_indices = @transform_1, window_bounds = array<i64: 16, 4>}, {pipeline_mode = #tpu.pipeline_mode<synchronous>, transform_indices = @transform_2, window_bounds = array<i64: 1, 4>}, {pipeline_mode = #tpu.pipeline_mode<synchronous>, transform_indices = @transform_3, window_bounds = array<i64: 4, 16>}, {pipeline_mode = #tpu.pipeline_mode<synchronous>, transform_indices = @transform_4, window_bounds = array<i64: 1, 16>}, {transform_indices = @transform_5, window_bounds = array<i64: 2, 16, 256>}]} {
    %c0 = arith.constant 0 : index
    %c0_0 = arith.constant 0 : index
    %c0_1 = arith.constant 0 : index
    %0 = vector.load %arg1[%c0, %c0_0, %c0_1] : memref<2x16x256xf32, #tpu.memory_space<vmem>>, vector<2x16x256xf32>
    %cst = arith.constant dense<0.000000e+00> : vector<2x16xf32>
    %1 = vector.multi_reduction <add>, %0, %cst [2] : vector<2x16x256xf32> to vector<2x16xf32>
    %2 = arith.mulf %0, %0 : vector<2x16x256xf32>
    %cst_2 = arith.constant dense<0.000000e+00> : vector<2x16xf32>
    %3 = vector.multi_reduction <add>, %2, %cst_2 [2] : vector<2x16x256xf32> to vector<2x16xf32>
    %cst_3 = arith.constant 3.906250e-03 : f32
    %4 = vector.broadcast %cst_3 : f32 to vector<2x16xf32>
    %5 = arith.mulf %1, %4 : vector<2x16xf32>
    %cst_4 = arith.constant 3.906250e-03 : f32
    %6 = vector.broadcast %cst_4 : f32 to vector<2x16xf32>
    %7 = arith.mulf %3, %6 : vector<2x16xf32>
    %8 = arith.mulf %5, %5 : vector<2x16xf32>
    %9 = arith.subf %7, %8 : vector<2x16xf32>
    %cst_5 = arith.constant 0.000000e+00 : f32
    %10 = vector.broadcast %cst_5 : f32 to vector<2x16xf32>
    %11 = arith.maximumf %9, %10 : vector<2x16xf32>
    %12 = math.sqrt %11 : vector<2x16xf32>
    %13 = arith.addf %5, %12 : vector<2x16xf32>
    %c0_6 = arith.constant 0 : index
    %c0_7 = arith.constant 0 : index
    %14 = vector.load %arg2[%c0_6, %c0_7] : memref<16x4xf32, #tpu.memory_space<vmem>>, vector<16x4xf32>
    %cst_8 = arith.constant dense<0.000000e+00> : vector<2x4xf32>
    %15 = tpu.matmul %13, %14, %cst_8 {dimension_numbers = #tpu.dot_dimension_numbers<[1], [0], [0], [1], [0, 0, 1, 1], [], []>} : vector<2x16xf32>, vector<16x4xf32>, vector<2x4xf32> -> vector<2x4xf32>
    %c0_9 = arith.constant 0 : index
    %c0_10 = arith.constant 0 : index
    %16 = vector.load %arg3[%c0_9, %c0_10] : memref<1x4xf32, #tpu.memory_space<vmem>>, vector<1x4xf32>
    %17 = vector.broadcast %16 : vector<1x4xf32> to vector<2x4xf32>
    %18 = arith.addf %15, %17 : vector<2x4xf32>
    %cst_11 = arith.constant 0.000000e+00 : f32
    %19 = vector.broadcast %cst_11 : f32 to vector<2x4xf32>
    %20 = arith.maximumf %18, %19 : vector<2x4xf32>
    %c0_12 = arith.constant 0 : index
    %c0_13 = arith.constant 0 : index
    %21 = vector.load %arg4[%c0_12, %c0_13] : memref<4x16xf32, #tpu.memory_space<vmem>>, vector<4x16xf32>
    %cst_14 = arith.constant dense<0.000000e+00> : vector<2x16xf32>
    %22 = tpu.matmul %20, %21, %cst_14 {dimension_numbers = #tpu.dot_dimension_numbers<[1], [0], [0], [1], [0, 0, 1, 1], [], []>} : vector<2x4xf32>, vector<4x16xf32>, vector<2x16xf32> -> vector<2x16xf32>
    %c0_15 = arith.constant 0 : index
    %c0_16 = arith.constant 0 : index
    %23 = vector.load %arg5[%c0_15, %c0_16] : memref<1x16xf32, #tpu.memory_space<vmem>>, vector<1x16xf32>
    %24 = vector.broadcast %23 : vector<1x16xf32> to vector<2x16xf32>
    %25 = arith.addf %22, %24 : vector<2x16xf32>
    %26 = arith.negf %25 : vector<2x16xf32>
    %27 = math.exp %26 : vector<2x16xf32>
    %cst_17 = arith.constant 1.000000e+00 : f32
    %28 = vector.broadcast %cst_17 : f32 to vector<2x16xf32>
    %29 = arith.addf %28, %27 : vector<2x16xf32>
    %30 = arith.divf %28, %29 : vector<2x16xf32>
    %31 = vector.shape_cast %30 : vector<2x16xf32> to vector<2x16x1xf32>
    %32 = vector.broadcast %31 : vector<2x16x1xf32> to vector<2x16x256xf32>
    %33 = arith.mulf %0, %32 : vector<2x16x256xf32>
    %c0_18 = arith.constant 0 : index
    %c0_19 = arith.constant 0 : index
    %c0_20 = arith.constant 0 : index
    %34 = vector.load %arg6[%c0_18, %c0_19, %c0_20] : memref<2x16x256xf32, #tpu.memory_space<vmem>>, vector<2x16x256xf32>
    tpu.vector_store %arg6[%c0_18, %c0_19, %c0_20], %33 {strides = array<i32>} : memref<2x16x256xf32, #tpu.memory_space<vmem>>, vector<2x16x256xf32>,
    return
  }
  func.func @transform_0(%arg0: i32) -> (i32, i32, i32) {
    %c0_i32 = arith.constant 0 : i32
    %c0_i32_0 = arith.constant 0 : i32
    %c0_i32_1 = arith.constant 0 : i32
    return %arg0, %c0_i32, %c0_i32_0 : i32, i32, i32
  }
  func.func @transform_1(%arg0: i32) -> (i32, i32) {
    %c0_i32 = arith.constant 0 : i32
    %c0_i32_0 = arith.constant 0 : i32
    %c0_i32_1 = arith.constant 0 : i32
    return %c0_i32, %c0_i32_0 : i32, i32
  }
  func.func @transform_2(%arg0: i32) -> (i32, i32) {
    %c0_i32 = arith.constant 0 : i32
    %c0_i32_0 = arith.constant 0 : i32
    %c0_i32_1 = arith.constant 0 : i32
    return %c0_i32, %c0_i32_0 : i32, i32
  }
  func.func @transform_3(%arg0: i32) -> (i32, i32) {
    %c0_i32 = arith.constant 0 : i32
    %c0_i32_0 = arith.constant 0 : i32
    %c0_i32_1 = arith.constant 0 : i32
    return %c0_i32, %c0_i32_0 : i32, i32
  }
  func.func @transform_4(%arg0: i32) -> (i32, i32) {
    %c0_i32 = arith.constant 0 : i32
    %c0_i32_0 = arith.constant 0 : i32
    %c0_i32_1 = arith.constant 0 : i32
    return %c0_i32, %c0_i32_0 : i32, i32
  }
  func.func @transform_5(%arg0: i32) -> (i32, i32, i32) {
    %c0_i32 = arith.constant 0 : i32
    %c0_i32_0 = arith.constant 0 : i32
    %c0_i32_1 = arith.constant 0 : i32
    return %arg0, %c0_i32, %c0_i32_0 : i32, i32, i32
  }
}

</mosaic_0001>

<bundles_post_ra>
// kernel: tpu_custom_call.1
= control target key start
LH: loop header
LB: loop body
LE: loop exit
PB: predicated region body
PF: predicated region fallthrough
CT: control target
= control target key end

     0   :  { %10 = vsyncpa [#allocation3], 0  ;;  %s614_s0 = inlined_call_operand.hbm [shape: f32[2,16,256], index: 0, kind: input, shape index: {}]   ;;  %s615_s1 = inlined_call_operand.vmem [shape: f32[16,4], index: 1, kind: input, shape index: {}]   ;;  %s616_s2 = inlined_call_operand.vmem [shape: f32[1,4], index: 2, kind: input, shape index: {}]   ;;  %s617_s3 = inlined_call_operand.vmem [shape: f32[4,16], index: 3, kind: input, shape index: {}]   ;;  %s618_s4 = inlined_call_operand.vmem [shape: f32[1,16], index: 4, kind: input, shape index: {}]   ;;  %s619_s5 = inlined_call_operand.hbm [shape: f32[2,16,256], index: 5, kind: output, shape index: {}]  }
   0x1   :  { %11 = vsyncpa [#allocation4], 0  ;;  %s478_s18 = smov [#allocation2]   ;;  %s430_s22 = scalar_lea.hbm %s614_s0, 1024 }
   0x2   :  { %s17_s19 = sshll.u32 %s478_s18, 4  ;;  %p431_p0 = scmp.ne.s32.totalorder %s614_s0, %s430_s22  ;;  %s18_s19 = int_to_ptr.vmem [resolvable:$true] %s17_s19 }
   0x3   :  { %p434_p1 = scmp.lt.u32.totalorder %s430_s22, %s614_s0 }
   0x5   :  { %p436_p2 = pnand %p434_p1, %p431_p0 }
   0x7   :  { %439 = shalt.err (!%p436_p2)
}
   0x8   :  { %s440_s27 = scalar_lea.vmem %s18_s19, 1024  ;;  %p445_p4 = scmp.lt.s32.totalorder %s18_s19, %s18_s19 }
   0x9   :  { %p441_p3 = scmp.ne.s32.totalorder %s18_s19, %s440_s27  ;;  %p446_p5 = scmp.lt.s32.totalorder %s440_s27, %s440_s27 }
   0xb   :  { %p447_p6 = por %p446_p5, %p445_p4 }
   0xd   :  { %p448_p7 = pnand %p447_p6, %p441_p3 }
   0xf   :  { %451 = shalt.err (!%p448_p7)
}
  0x10   :  { %s479_s28 = smov 256   ;;  %s480_s29 = smov 16  }
  0x11   :  { %23 = dma.hbm_to_vmem [thread:$0]  %s614_s0, 1024, %s18_s19, [#allocation3], %s479_s28, %s479_s28, %s480_s29  }
  0x12   :  { %474 = dma.done.wait [#allocation3], 1024  }
  0x13   :  { %475 = vsyncadd [#allocation3], 4294966272  ;;  %v530_v0 = vld [vmem:[#allocation2 + $0x20] sm:$0xff]  ;;  %v532_v1 = vld [vmem:[#allocation2 + $0x28] sm:$0xff]  ;;  %v481_v26 = vmov 0.0|0.0   ;;  %vm482_vm0 = vmmov 0   ;;  %v140_v57 = vlaneseq }
  0x14   :  { %v534_v2 = vld [vmem:[#allocation2] sm:$0xff]  ;;  %v49_v3 = vadd.f32 %v532_v1, %v530_v0  ;;  %v538_v4 = vld [vmem:[#allocation2 + $0x8] sm:$0xff]  ;;  %v540_v5 = vld [vmem:[#allocation2 + $0x30] sm:$0xff]  ;;  %v59_v20 = vmul.f32 %v530_v0, %v530_v0  ;;  %v60_v21 = vmul.f32 %v532_v1, %v532_v1  ;;  %408 = vmatprep.subr.bf16.mxu0 %v481_v26  ;;  %v483_v28 = vmov 0.0  }
  0x15   :  { %v542_v6 = vld [vmem:[#allocation2 + $0x38] sm:$0xff]  ;;  %v43_v7 = vadd.f32 %v538_v4, %v534_v2  ;;  %v546_v8 = vld [vmem:[#allocation2 + $0x10] sm:$0xff]  ;;  %v55_v14 = vmul.f32 %v534_v2, %v534_v2  ;;  %v56_v15 = vmul.f32 %v538_v4, %v538_v4  ;;  %v61_v17 = vmul.f32 %v540_v5, %v540_v5  ;;  %v127_v24 = vld [vmem:[%s615_s1] sm:$0xff]  ;;  %400 = vmatprep.mubr.msk.f32.mxu0 %vm482_vm0, %v483_v28 }
  0x16   :  { %v548_v9 = vld [vmem:[#allocation2 + $0x18] sm:$0xff]  ;;  %50 = vadd.xlane.f32.xlu1 %v49_v3  ;;  %v52_v10 = vadd.f32 %v542_v6, %v540_v5  ;;  %v57_v11 = vmul.f32 %v546_v8, %v546_v8  ;;  %v62_v18 = vmul.f32 %v542_v6, %v542_v6  ;;  %v69_v23 = vadd.f32 %v60_v21, %v59_v20  ;;  %v128_v25 = vld [vmem:[%s615_s1 + $0x8] sm:$0xff] }
  0x17   :  { %v58_v12 = vmul.f32 %v548_v9, %v548_v9  ;;  %44 = vadd.xlane.f32.xlu0 %v43_v7  ;;  %v46_v13 = vadd.f32 %v548_v9, %v546_v8  ;;  %v63_v19 = vadd.f32 %v56_v15, %v55_v14  ;;  %v409_v27 = vpack.c.bf16 %v128_v25, %v127_v24 }
  0x18   :  { %v72_v22 = vadd.f32 %v62_v18, %v61_v17  ;;  %403 = vmatprep.subr.mxu1 %v483_v28  ;;  %405 = vmatprep.mubr.msk.f32.mxu1 %vm482_vm0, %v483_v28  ;;  %v141_v58 = vand.u32 127, %v140_v57  ;;  %v576_v60 = vshrl.u32 %v140_v57, 7  ;;  %vm151_vm9 = vcmask 130112  }
  0x19   :  { %v66_v16 = vadd.f32 %v58_v12, %v57_v11  ;;  %410 = vmatpush3.bf16.msra.mxu0 %v409_v27  ;;  %vm162_vm10 = vcmask 1041409   ;;  %vm164_vm11 = vcmask 130048   ;;  %vm250_vm12 = vcmask 1043456  }
  0x1a   :  { %53 = vadd.xlane.f32.xlu1 %v52_v10  ;;  %v146_v63 = vadd.s32 4294967288, %v141_v58  ;;  %v144_v15 = vsub.s32 %v141_v58, %v576_v60  ;;  %vm246_vm13 = vcmask 31744  }
  0x1b   :  { %47 = vadd.xlane.f32.xlu0 %v46_v13 }
  0x1e   :  { %67 = vadd.xlane.f32.xlu1 %v66_v16 }
  0x1f   :  { %64 = vadd.xlane.f32.xlu0 %v63_v19  ;;  %v149_v19 = vsub.s32 %v146_v63, %v576_v60 }
  0x22   :  { %73 = vadd.xlane.f32.xlu1 %v72_v22 }
  0x23   :  { %70 = vadd.xlane.f32.xlu0 %v69_v23 }
  0xa3   :  { %v51_v29 = vpop.xlane.xlu1 %50 }
  0xa4   :  { %v45_v30 = vpop.xlane.xlu0 %44  ;;  %v77_v40 = vmul.f32 0.00390625, %v51_v29 }
  0xa5   :  { %v75_v33 = vmul.f32 0.00390625, %v45_v30 }
  0xa6   :  { %v85_v50 = vmul.f32 %v77_v40, %v77_v40 }
  0xa7   :  { %v54_v31 = vpop.xlane.xlu1 %53  ;;  %v83_v41 = vmul.f32 %v75_v33, %v75_v33 }
  0xa8   :  { %v48_v32 = vpop.xlane.xlu0 %47  ;;  %v78_v36 = vmul.f32 0.00390625, %v54_v31 }
  0xa9   :  { %v76_v34 = vmul.f32 0.00390625, %v48_v32 }
  0xaa   :  { %v86_v46 = vmul.f32 %v78_v36, %v78_v36 }
  0xab   :  { %v68_v35 = vpop.xlane.xlu1 %67  ;;  %v84_v37 = vmul.f32 %v76_v34, %v76_v34 }
  0xac   :  { %v80_v38 = vmul.f32 0.00390625, %v68_v35  ;;  %v65_v39 = vpop.xlane.xlu0 %64 }
  0xad   :  { %v79_v42 = vmul.f32 0.00390625, %v65_v39  ;;  %v238_v39 = vld [vmem:[%s617_s3] sm:$0xf] }
  0xae   :  { %v88_v43 = vsub.f32 %v80_v38, %v84_v37  ;;  %404 = vmatpush3.msk.msra.mxu1 %vm250_vm12, %v238_v39 }
  0xaf   :  { %v87_v44 = vsub.f32 %v79_v42, %v83_v41  ;;  %v74_v45 = vpop.xlane.xlu1 %73 }
  0xb0   :  { %v92_v47 = vmax.f32 %v88_v43, 0.0  ;;  %v82_v48 = vmul.f32 0.00390625, %v74_v45  ;;  %v71_v49 = vpop.xlane.xlu0 %70 }
  0xb1   :  { %v91_v51 = vmax.f32 %v87_v44, 0.0  ;;  %v81_v52 = vmul.f32 0.00390625, %v71_v49  ;;  %v387_v44 = vld [vmem:[%s618_s4] ss:$0 sm:$0xff] }
  0xb2   :  { %418 = vrsqrt.f32 %v92_v47  ;;  %v90_v53 = vsub.f32 %v82_v48, %v86_v46  ;;  %vm104_vm1 = vcmp.eq.f32.partialorder %v92_v47, inf  ;;  %v107_v7 = vand.u32 2147483648, %v92_v47 }
  0xb3   :  { %420 = vrsqrt.f32 %v91_v51  ;;  %v89_v54 = vsub.f32 %v81_v52, %v85_v50  ;;  %vm97_vm2 = vcmp.eq.f32.partialorder %v91_v51, inf  ;;  %v100_v10 = vand.u32 2147483648, %v91_v51 }
  0xb4   :  { %v94_v55 = vmax.f32 %v90_v53, 0.0  ;;  %vm106_vm3 = vcmp.eq.f32.partialorder %v92_v47, 0.0  ;;  %vm99_vm4 = vcmp.eq.f32.partialorder %v91_v51, 0.0 }
  0xb5   :  { %v93_v56 = vmax.f32 %v89_v54, 0.0  ;;  %v343_v54 = vsub.s32 1, %v576_v60 }
  0xb6   :  { %422 = vrsqrt.f32 %v94_v55  ;;  %vm118_vm5 = vcmp.eq.f32.partialorder %v94_v55, inf  ;;  %v121_v21 = vand.u32 2147483648, %v94_v55  ;;  %vm120_vm7 = vcmp.eq.f32.partialorder %v94_v55, 0.0 }
  0xb7   :  { %424 = vrsqrt.f32 %v93_v56  ;;  %vm111_vm6 = vcmp.eq.f32.partialorder %v93_v56, inf  ;;  %v114_v24 = vand.u32 2147483648, %v93_v56  ;;  %vm113_vm8 = vcmp.eq.f32.partialorder %v93_v56, 0.0 }
  0xbc   :  { %v419_v59 = vpop.eup %418 }
  0xbd   :  { %v421_v61 = vpop.eup %420  ;;  %v103_v62 = vmul.f32 %v419_v59, %v92_v47 }
  0xbe   :  { %v96_v3 = vmul.f32 %v421_v61, %v91_v51 }
  0xbf   :  { %v105_v11 = vsel %vm104_vm1, %v92_v47, %v103_v62 }
  0xc0   :  { %v423_v12 = vpop.eup %422  ;;  %v98_v13 = vsel %vm97_vm2, %v91_v51, %v96_v3  ;;  %v108_v14 = vsel %vm106_vm3, %v107_v7, %v105_v11  ;;  %v332_v51 = vsub.s32 0, %v576_v60 }
  0xc1   :  { %v425_v16 = vpop.eup %424  ;;  %v101_v17 = vsel %vm99_vm4, %v100_v10, %v98_v13  ;;  %v117_v18 = vmul.f32 %v423_v12, %v94_v55  ;;  %v124_v23 = vadd.f32 %v108_v14, %v76_v34 }
  0xc2   :  { %v110_v20 = vmul.f32 %v425_v16, %v93_v56  ;;  %v123_v22 = vadd.f32 %v101_v17, %v75_v33 }
  0xc3   :  { %v119_v25 = vsel %vm118_vm5, %v94_v55, %v117_v18  ;;  %v150_v32 = vrot.slane %v124_v23, %v149_v19 }
  0xc4   :  { %v112_v26 = vsel %vm111_vm6, %v93_v56, %v110_v20  ;;  %v122_v27 = vsel %vm120_vm7, %v121_v21, %v119_v25  ;;  %v145_v31 = vrot.slane %v123_v22, %v144_v15 }
  0xc5   :  { %v115_v28 = vsel %vm113_vm8, %v114_v24, %v112_v26  ;;  %v126_v29 = vadd.f32 %v122_v27, %v78_v36  ;;  %v385_v36 = vld [vmem:[%s616_s2] ss:$0 sm:$0xff]  ;;  %s484_s2 = smov [#allocation5]  }
  0xc6   :  { %v125_v30 = vadd.f32 %v115_v28, %v77_v40  ;;  %v152_v38 = vsel %vm151_vm9, %v150_v32, %v145_v31  ;;  %s373_s3 = sshll.u32 %s484_s2, 4  ;;  %s374_s3 = int_to_ptr.vmem [resolvable:$true] %s373_s3 }
  0xc7   :  { %v160_v35 = vrot.slane %v126_v29, %v149_v19  ;;  %s452_s4 = scalar_lea.vmem %s374_s3, 1024  ;;  %p457_p9 = scmp.lt.s32.totalorder %s374_s3, %s374_s3 }
  0xc8   :  { %v156_v37 = vrot.slane %v125_v30, %v144_v15  ;;  %p453_p8 = scmp.ne.s32.totalorder %s374_s3, %s452_s4  ;;  %p458_p10 = scmp.lt.s32.totalorder %s452_s4, %s452_s4 }
  0xca   :  { %v161_v33 = vsel %vm151_vm9, %v160_v35, %v156_v37  ;;  %p459_p11 = por %p458_p10, %p457_p9 }
  0xcb   :  { %v163_v34 = vsel %vm162_vm10, %v161_v33, %v152_v38 }
  0xcc   :  { %401 = vmatmul.mubr.msk.f32.vlgmr.msra.gmra.mrb[0].mxu0 %vm164_vm11, %v163_v34  ;;  %p460_p12 = pnand %p459_p11, %p453_p8 }
 0x19f   :  { %v233_v40 = vpop.f32.mrb[0].mxu0 }
 0x1a0   :  { %v234_v41 = vadd.f32 %v385_v36, %v233_v40  ;;  %v402_v42 = vpop.f32.mrb[1].mxu0 }
 0x1a2   :  { %v237_v43 = vmax.f32 %v234_v41, 0.0 }
 0x1a4   :  { %406 = vmatmul.mubr.msk.f32.vlgmr.msra.gmra.mrb[0].mxu1 %vm246_vm13, %v237_v43 }
 0x277   :  { %v320_v45 = vpop.f32.mrb[0].mxu1 }
 0x278   :  { %v321_v46 = vadd.f32 %v387_v44, %v320_v45  ;;  %v407_v47 = vpop.f32.mrb[1].mxu1 }
 0x27a   :  { %v390_v48 = vmul.f32 -1.442695, %v321_v46 }
 0x27c   :  { %426 = vpow2.f32 %v390_v48 }
 0x286   :  { %v427_v49 = vpop.eup %426 }
 0x287   :  { %v327_v50 = vadd.f32 1.0, %v427_v49 }
 0x289   :  { %428 = vrcp.f32 %v327_v50 }
 0x293   :  { %v429_v52 = vpop.eup %428 }
 0x294   :  { %v333_v53 = vrot.slane %v429_v52, %v332_v51  ;;  %v344_v55 = vrot.slane %v429_v52, %v343_v54 }
 0x296   :  { %339 = vbcast.lane.b32.xlu1 %v333_v53, 264  ;;  %335 = vbcast.lane.b32.xlu0 %v333_v53, 256 }
 0x29a   :  { %346 = vbcast.lane.b32.xlu1 %v344_v55, 256 }
 0x29e   :  { %350 = vbcast.lane.b32.xlu1 %v344_v55, 264 }
 0x308   :  { %v340_v56 = vpop.permute.xlu1 %339  ;;  %v336_v57 = vpop.permute.xlu0 %335 }
 0x309   :  { %v354_v58 = vmul.f32 %v340_v56, %v546_v8  ;;  %v355_v59 = vmul.f32 %v340_v56, %v548_v9  ;;  %v352_v61 = vmul.f32 %v336_v57, %v534_v2  ;;  %v353_v62 = vmul.f32 %v336_v57, %v538_v4 }
 0x30b   :  { %362 = vst [vmem:[#allocation5 + $0x10] sm:$0xff] %v354_v58  ;;  %363 = vst [vmem:[#allocation5 + $0x18] sm:$0xff] %v355_v59 }
 0x30c   :  { %360 = vst [vmem:[#allocation5] sm:$0xff] %v352_v61  ;;  %361 = vst [vmem:[#allocation5 + $0x8] sm:$0xff] %v353_v62  ;;  %v347_v60 = vpop.permute.xlu1 %346 }
 0x30d   :  { %v356_v63 = vmul.f32 %v347_v60, %v530_v0  ;;  %v357_v3 = vmul.f32 %v347_v60, %v532_v1 }
 0x30f   :  { %364 = vst [vmem:[#allocation5 + $0x20] sm:$0xff] %v356_v63  ;;  %365 = vst [vmem:[#allocation5 + $0x28] sm:$0xff] %v357_v3 }
 0x310   :  { %v351_v8 = vpop.permute.xlu1 %350 }
 0x311   :  { %v358_v9 = vmul.f32 %v351_v8, %v540_v5  ;;  %v359_v2 = vmul.f32 %v351_v8, %v542_v6 }
 0x313   :  { %366 = vst [vmem:[#allocation5 + $0x30] sm:$0xff] %v358_v9  ;;  %367 = vst [vmem:[#allocation5 + $0x38] sm:$0xff] %v359_v2 }
 0x314   :  { %463 = shalt.err (!%p460_p12)
}
 0x315   :  { %s464_s17 = scalar_lea.hbm %s619_s5, 1024 }
 0x316   :  { %p465_p13 = scmp.ne.s32.totalorder %s619_s5, %s464_s17  ;;  %p468_p0 = scmp.lt.u32.totalorder %s464_s17, %s619_s5 }
 0x318   :  { %p470_p1 = pnand %p468_p0, %p465_p13 }
 0x31a   :  { %473 = shalt.err (!%p470_p1)
}
 0x31b   :  { %379 = dma.vmem_to_hbm [thread:$0]  %s374_s3, 1024, %s619_s5, [#allocation4], %s479_s28, %s479_s28, %s480_s29  }
 0x31c   :  { %476 = dma.done.wait [#allocation4], 1024  }
 0x31d   :  { %477 = vsyncadd [#allocation4], 4294966272 }
 0x31e   :  { %383 = vsyncpa [#allocation3], 1 }
 0x31f   :  { %384 = vsyncpa [#allocation4], 1 }

</bundles_post_ra>
